<compile_context>
chip_gen: v7x
topology: tpu7x:2x2x1
jax: 0.10.0
libtpu: 0.0.40
codegen_flags: <defaults>
</compile_context>

<pallas_src>
import functools

import jax
import jax.numpy as jnp
from jax import lax
from jax.experimental import pallas as pl
from jax.experimental.pallas import tpu as pltpu


def _net_encoder_kernel(
    x_ref, adj_ref,
    w_init_ref, b_init_ref,
    ws_ref, bs_ref,
    w_att_ref, b_att_ref,
    node_emb_ref, g_emb_ref, fused_ref, init_ref,
    *, compute_dtype, approx_recip,
):
    bt, n, f = x_ref.shape
    d = w_init_ref.shape[1]
    cd = compute_dtype

    x = x_ref[...]        # (Bt, N, F)
    adj = adj_ref[...]    # (Bt, N, N)

    # ---- init_lin: one MXU-shaped matmul over all Bt*N rows -----------------
    h0 = jnp.dot(x.reshape(bt * n, f).astype(cd),
                 w_init_ref[...].astype(cd),
                 preferred_element_type=jnp.float32)
    h0 = (h0 + b_init_ref[...]).reshape(bt, n, d)            # (Bt, N, D) f32

    # ---- factored GCN normalization: A_norm @ H = d*(A @ (d*H)) + (d*d)*H ---
    # (no eye / iota / transpose; deg = row-sum(adj) + 1 from the self loop)
    deg = jnp.sum(adj, axis=-1, keepdims=True) + 1.0          # (Bt, N, 1) >= 1
    dinv = lax.rsqrt(deg)                                     # (Bt, N, 1)
    dinv2 = dinv * dinv
    adj_c = adj.astype(cd)

    # ---- 3 GCN layers: H <- A_norm @ (H @ W) + b; ReLU except last ----------
    h = h0
    num_layers = ws_ref.shape[0]
    for layer in range(num_layers):
        w = ws_ref[layer].astype(cd)                          # (D, D)
        b = bs_ref[layer]                                     # (1, D) f32
        hw = jnp.dot(h.reshape(bt * n, d).astype(cd), w,
                     preferred_element_type=jnp.float32).reshape(bt, n, d)
        agg = jnp.einsum("bnm,bmd->bnd", adj_c, (dinv * hw).astype(cd),
                         preferred_element_type=jnp.float32)
        h = dinv * agg + dinv2 * hw + b
        if layer < num_layers - 1:
            h = jnp.maximum(h, 0.0)

    # ---- graph pooling (computed for all Bt graphs, stored once) ------------
    mean_pool = jnp.mean(h, axis=1)                           # (Bt, D)

    gate = jnp.sum(h * w_att_ref[...], axis=-1, keepdims=True) + b_att_ref[0, 0]
    gate = gate - jnp.max(gate, axis=1, keepdims=True)        # (Bt, N, 1)
    e = jnp.exp(gate)
    attn = e * pl.reciprocal(jnp.sum(e, axis=1, keepdims=True), approx=approx_recip)
    att_pool = jnp.sum(attn * h, axis=1)                      # (Bt, D)

    g = mean_pool + att_pool                                  # (Bt, D)

    # ---- outputs (all lane-dense, one store each per step) ------------------
    node_emb_ref[...] = h
    g_emb_ref[...] = g[:, None, :]
    fused_ref[...] = h + g[:, None, :] + h0
    init_ref[...] = h0


def _choose_batch_tile(B, N, F, D, budget_bytes=24 << 20):
    """Pick graphs-per-step so the double-buffered working set stays well inside
    the VMEM budget (v7x-safe: 64 MiB physical, 48 MiB scoped limit set below)."""
    per_graph = 4 * (
        2 * (N * F + N * N)          # x, adj (double-buffered)
        + 2 * (3 * N * D + D)        # node_emb / fused / init / g_emb (double-buffered)
        + 5 * N * D + N * N          # h0, h, hw, scaled, agg intermediates
    )
    bt = max(1, min(B, budget_bytes // max(per_graph, 1), 128))
    return int(bt)


def net_encoder_forward(x, adj, params, *, batch_tile=None,
                        matmul_dtype=jnp.float32, approx_recip=True):
    """x: [B,N,F], adj: [B,N,N] -> (node_emb [B*N,D], g_emb [B,D], fused [B,N,D], init [B,N,D])."""
    B, N, F = x.shape
    D = params["w_init"].shape[1]

    bt = batch_tile if batch_tile is not None else _choose_batch_tile(B, N, F, D)
    bt = max(1, min(int(bt), B))
    Bp = ((B + bt - 1) // bt) * bt
    if Bp != B:
        pad = Bp - B
        x = jnp.pad(x, ((0, pad), (0, 0), (0, 0)))
        adj = jnp.pad(adj, ((0, pad), (0, 0), (0, 0)))

    ws = jnp.stack([params["w0"], params["w1"], params["w2"]])   # (3, D, D)
    bs = jnp.stack([params["b0"], params["b1"], params["b2"]])   # (3, 1, D)

    def full(shape):
        return pl.BlockSpec(shape, lambda i: (0,) * len(shape))

    grid_spec = pltpu.PrefetchScalarGridSpec(
        num_scalar_prefetch=0,
        grid=(Bp // bt,),
        in_specs=[
            pl.BlockSpec((bt, N, F), lambda i: (i, 0, 0)),   # x
            pl.BlockSpec((bt, N, N), lambda i: (i, 0, 0)),   # adj
            full((F, D)), full((1, D)),                      # init_lin
            full((3, D, D)), full((3, 1, D)),                # stacked GCN weights/biases
            full((1, D)),                                    # attention gate weight
            pl.BlockSpec(memory_space=pltpu.MemorySpace.SMEM),  # attention gate bias (scalar)
        ],
        out_specs=[
            pl.BlockSpec((bt, N, D), lambda i: (i, 0, 0)),   # node_emb (dense)
            pl.BlockSpec((bt, 1, D), lambda i: (i, 0, 0)),   # g_emb
            pl.BlockSpec((bt, N, D), lambda i: (i, 0, 0)),   # fused
            pl.BlockSpec((bt, N, D), lambda i: (i, 0, 0)),   # node_init_dense
        ],
    )

    out_shape = (
        jax.ShapeDtypeStruct((Bp, N, D), jnp.float32),
        jax.ShapeDtypeStruct((Bp, 1, D), jnp.float32),
        jax.ShapeDtypeStruct((Bp, N, D), jnp.float32),
        jax.ShapeDtypeStruct((Bp, N, D), jnp.float32),
    )

    kernel = functools.partial(_net_encoder_kernel,
                               compute_dtype=matmul_dtype,
                               approx_recip=approx_recip)

    node_dense, g_emb, fused, node_init_dense = pl.pallas_call(
        kernel,
        out_shape=out_shape,
        grid_spec=grid_spec,
        compiler_params=pltpu.CompilerParams(
            dimension_semantics=("parallel",),
            vmem_limit_bytes=48 * 1024 * 1024,
        ),
    )(
        x, adj,
        params["w_init"], params["b_init"],
        ws, bs,
        params["w_att"], params["b_att"],
    )

    node_dense = node_dense[:B]
    g_emb = g_emb[:B, 0, :]
    fused = fused[:B]
    node_init_dense = node_init_dense[:B]
    node_emb = node_dense.reshape(B * N, D)   # flat node list (all graphs same size)
    return node_emb, g_emb, fused, node_init_dense


def _reference_forward(x, adj, params):
    """Pure-JAX reference mirroring the module semantics (for validation)."""
    B, N, F = x.shape
    D = params["w_init"].shape[1]
    h0 = x @ params["w_init"] + params["b_init"]                      # (B,N,D)
    eye = jnp.eye(N, dtype=jnp.float32)[None]
    a_hat = adj + eye
    deg = jnp.sum(a_hat, axis=-1, keepdims=True)
    dis = 1.0 / jnp.sqrt(deg)
    a_norm = dis * a_hat * jnp.swapaxes(dis, -1, -2)
    h = h0
    for w, b, last in ((params["w0"], params["b0"], False),
                       (params["w1"], params["b1"], False),
                       (params["w2"], params["b2"], True)):
        h = jnp.einsum("bnm,bmd->bnd", a_norm, h @ w) + b
        if not last:
            h = jnp.maximum(h, 0.0)
    mean_pool = jnp.mean(h, axis=1)                                    # (B,D)
    gate = jnp.sum(h * params["w_att"], axis=-1, keepdims=True) + params["b_att"][0, 0]
    attn = jax.nn.softmax(gate, axis=1)
    att_pool = jnp.sum(attn * h, axis=1)                               # (B,D)
    g_emb = mean_pool + att_pool
    fused = h + g_emb[:, None, :] + h0
    return h.reshape(B * N, D), g_emb, fused, h0


def make_params(key, feat_dim, embedding_dim):
    ks = jax.random.split(key, 6)
    s = 0.1
    return {
        "w_init": s * jax.random.normal(ks[0], (feat_dim, embedding_dim), jnp.float32),
        "b_init": s * jax.random.normal(ks[1], (1, embedding_dim), jnp.float32),
        "w0": s * jax.random.normal(ks[2], (embedding_dim, embedding_dim), jnp.float32),
        "b0": jnp.zeros((1, embedding_dim), jnp.float32),
        "w1": s * jax.random.normal(ks[3], (embedding_dim, embedding_dim), jnp.float32),
        "b1": jnp.zeros((1, embedding_dim), jnp.float32),
        "w2": s * jax.random.normal(ks[4], (embedding_dim, embedding_dim), jnp.float32),
        "b2": jnp.zeros((1, embedding_dim), jnp.float32),
        "w_att": s * jax.random.normal(ks[5], (1, embedding_dim), jnp.float32),
        "b_att": jnp.zeros((1, 1), jnp.float32),
    }


if __name__ == "__main__":
    B, N, FEAT, EDGE_DIM, EMB = 2, 8, 4, 2, 128  # edge_dim unused by GCNConv

    key = jax.random.PRNGKey(0)
    kx, ka, kp = jax.random.split(key, 3)

    x = jax.random.normal(kx, (B, N, FEAT), jnp.float32)

    # random symmetric 0/1 adjacency, no self loops
    raw = jax.random.bernoulli(ka, 0.4, (B, N, N))
    adj = jnp.logical_or(raw, jnp.swapaxes(raw, -1, -2)).astype(jnp.float32)
    adj = adj * (1.0 - jnp.eye(N, dtype=jnp.float32)[None])

    params = make_params(kp, FEAT, EMB)
    refs = _reference_forward(x, adj, params)

    # 1) exact path: f32 MXU inputs, exact reciprocal — strict check
    outs = net_encoder_forward(x, adj, params,
                               matmul_dtype=jnp.float32, approx_recip=False)
    outs = jax.block_until_ready(outs)
    for o, r in zip(outs, refs):
        assert o.shape == r.shape, (o.shape, r.shape)
        err = float(jnp.max(jnp.abs(o - r)))
        assert err < 1e-4, err

    # 2) fast path: bf16 MXU inputs (f32 accumulation) + approx EUP reciprocal — loose check
    outs_fast = net_encoder_forward(x, adj, params,
                                    matmul_dtype=jnp.bfloat16, approx_recip=True)
    outs_fast = jax.block_until_ready(outs_fast)
    for o, r in zip(outs_fast, refs):
        assert o.shape == r.shape, (o.shape, r.shape)
        err = float(jnp.max(jnp.abs(o - r)))
        scale = float(jnp.max(jnp.abs(r))) + 1.0
        assert err < 5e-2 * scale, (err, scale)

    print("KERNEL_OK")
</pallas_src>

<mosaic_0001>
module attributes {stable_mosaic.version = 11 : i64} {
  func.func @_net_encoder_kernel(%arg0: i32, %arg1: memref<2x8x4xf32, #tpu.memory_space<vmem>>, %arg2: memref<2x8x8xf32, #tpu.memory_space<vmem>>, %arg3: memref<4x128xf32, #tpu.memory_space<vmem>>, %arg4: memref<1x128xf32, #tpu.memory_space<vmem>>, %arg5: memref<3x128x128xf32, #tpu.memory_space<vmem>>, %arg6: memref<3x1x128xf32, #tpu.memory_space<vmem>>, %arg7: memref<1x128xf32, #tpu.memory_space<vmem>>, %arg8: memref<1x1xf32, #tpu.memory_space<smem>>, %arg9: memref<2x8x128xf32, #tpu.memory_space<vmem>>, %arg10: memref<2x1x128xf32, #tpu.memory_space<vmem>>, %arg11: memref<2x8x128xf32, #tpu.memory_space<vmem>>, %arg12: memref<2x8x128xf32, #tpu.memory_space<vmem>>) attributes {dimension_semantics = [#tpu.dimension_semantics<parallel>], iteration_bounds = array<i64: 1>, scalar_prefetch = 0 : i64, scratch_operands = 0 : i64, tpu.core_type = #tpu.core_type<tc>, window_params = [{transform_indices = @transform_0, window_bounds = array<i64: 2, 8, 4>}, {transform_indices = @transform_1, window_bounds = array<i64: 2, 8, 8>}, {pipeline_mode = #tpu.pipeline_mode<synchronous>, transform_indices = @transform_2, window_bounds = array<i64: 4, 128>}, {pipeline_mode = #tpu.pipeline_mode<synchronous>, transform_indices = @transform_3, window_bounds = array<i64: 1, 128>}, {pipeline_mode = #tpu.pipeline_mode<synchronous>, transform_indices = @transform_4, window_bounds = array<i64: 3, 128, 128>}, {pipeline_mode = #tpu.pipeline_mode<synchronous>, transform_indices = @transform_5, window_bounds = array<i64: 3, 1, 128>}, {pipeline_mode = #tpu.pipeline_mode<synchronous>, transform_indices = @transform_6, window_bounds = array<i64: 1, 128>}, {transform_indices = @transform_7, window_bounds = array<i64: 1, 1>}, {transform_indices = @transform_8, window_bounds = array<i64: 2, 8, 128>}, {transform_indices = @transform_9, window_bounds = array<i64: 2, 1, 128>}, {transform_indices = @transform_10, window_bounds = array<i64: 2, 8, 128>}, {transform_indices = @transform_11, window_bounds = array<i64: 2, 8, 128>}]} {
    %c0 = arith.constant 0 : index
    %c0_0 = arith.constant 0 : index
    %c0_1 = arith.constant 0 : index
    %0 = vector.load %arg1[%c0, %c0_0, %c0_1] : memref<2x8x4xf32, #tpu.memory_space<vmem>>, vector<2x8x4xf32>
    %c0_2 = arith.constant 0 : index
    %c0_3 = arith.constant 0 : index
    %c0_4 = arith.constant 0 : index
    %1 = vector.load %arg2[%c0_2, %c0_3, %c0_4] : memref<2x8x8xf32, #tpu.memory_space<vmem>>, vector<2x8x8xf32>
    %2 = vector.shape_cast %0 : vector<2x8x4xf32> to vector<16x4xf32>
    %c0_5 = arith.constant 0 : index
    %c0_6 = arith.constant 0 : index
    %3 = vector.load %arg3[%c0_5, %c0_6] : memref<4x128xf32, #tpu.memory_space<vmem>>, vector<4x128xf32>
    %cst = arith.constant dense<0.000000e+00> : vector<16x128xf32>
    %4 = tpu.matmul %2, %3, %cst {dimension_numbers = #tpu.dot_dimension_numbers<[1], [0], [0], [1], [0, 0, 1, 1], [], []>} : vector<16x4xf32>, vector<4x128xf32>, vector<16x128xf32> -> vector<16x128xf32>
    %c0_7 = arith.constant 0 : index
    %c0_8 = arith.constant 0 : index
    %5 = vector.load %arg4[%c0_7, %c0_8] : memref<1x128xf32, #tpu.memory_space<vmem>>, vector<1x128xf32>
    %6 = vector.broadcast %5 : vector<1x128xf32> to vector<16x128xf32>
    %7 = arith.addf %4, %6 : vector<16x128xf32>
    %8 = vector.shape_cast %7 : vector<16x128xf32> to vector<2x8x128xf32>
    %cst_9 = arith.constant dense<0.000000e+00> : vector<2x8xf32>
    %9 = vector.multi_reduction <add>, %1, %cst_9 [2] : vector<2x8x8xf32> to vector<2x8xf32>
    %10 = vector.shape_cast %9 : vector<2x8xf32> to vector<2x8x1xf32>
    %cst_10 = arith.constant 1.000000e+00 : f32
    %11 = vector.broadcast %cst_10 : f32 to vector<2x8x1xf32>
    %12 = arith.addf %10, %11 : vector<2x8x1xf32>
    %13 = math.rsqrt %12 : vector<2x8x1xf32>
    %14 = arith.mulf %13, %13 : vector<2x8x1xf32>
    %c0_11 = arith.constant 0 : index
    %c0_12 = arith.constant 0 : index
    %c0_13 = arith.constant 0 : index
    %15 = vector.load %arg5[%c0_11, %c0_12, %c0_13] : memref<3x128x128xf32, #tpu.memory_space<vmem>>, vector<1x128x128xf32>
    %16 = vector.shape_cast %15 : vector<1x128x128xf32> to vector<128x128xf32>
    %c0_14 = arith.constant 0 : index
    %c0_15 = arith.constant 0 : index
    %c0_16 = arith.constant 0 : index
    %17 = vector.load %arg6[%c0_14, %c0_15, %c0_16] : memref<3x1x128xf32, #tpu.memory_space<vmem>>, vector<1x1x128xf32>
    %18 = vector.shape_cast %17 : vector<1x1x128xf32> to vector<1x128xf32>
    %19 = vector.shape_cast %8 : vector<2x8x128xf32> to vector<16x128xf32>
    %cst_17 = arith.constant dense<0.000000e+00> : vector<16x128xf32>
    %20 = tpu.matmul %19, %16, %cst_17 {dimension_numbers = #tpu.dot_dimension_numbers<[1], [0], [0], [1], [0, 0, 1, 1], [], []>} : vector<16x128xf32>, vector<128x128xf32>, vector<16x128xf32> -> vector<16x128xf32>
    %21 = vector.shape_cast %20 : vector<16x128xf32> to vector<2x8x128xf32>
    %22 = vector.broadcast %13 : vector<2x8x1xf32> to vector<2x8x128xf32>
    %23 = arith.mulf %22, %21 : vector<2x8x128xf32>
    "tpu.trace_start"() <{level = 10 : i32, message = "bnm,bmd->bnd"}> : () -> ()
    %cst_18 = arith.constant dense<0.000000e+00> : vector<2x8x128xf32>
    %24 = tpu.matmul %1, %23, %cst_18 {dimension_numbers = #tpu.dot_dimension_numbers<[2], [1], [1], [2], [0, 0, 0, 1, 1, 2], [0], [0]>} : vector<2x8x8xf32>, vector<2x8x128xf32>, vector<2x8x128xf32> -> vector<2x8x128xf32>
    "tpu.trace_stop"() : () -> ()
    %25 = vector.broadcast %13 : vector<2x8x1xf32> to vector<2x8x128xf32>
    %26 = arith.mulf %25, %24 : vector<2x8x128xf32>
    %27 = vector.broadcast %14 : vector<2x8x1xf32> to vector<2x8x128xf32>
    %28 = arith.mulf %27, %21 : vector<2x8x128xf32>
    %29 = arith.addf %26, %28 : vector<2x8x128xf32>
    %30 = vector.shape_cast %18 : vector<1x128xf32> to vector<1x1x128xf32>
    %31 = vector.broadcast %30 : vector<1x1x128xf32> to vector<2x8x128xf32>
    %32 = arith.addf %29, %31 : vector<2x8x128xf32>
    %cst_19 = arith.constant 0.000000e+00 : f32
    %33 = vector.broadcast %cst_19 : f32 to vector<2x8x128xf32>
    %34 = arith.maximumf %32, %33 : vector<2x8x128xf32>
    %c1 = arith.constant 1 : index
    %c0_20 = arith.constant 0 : index
    %c0_21 = arith.constant 0 : index
    %35 = vector.load %arg5[%c1, %c0_20, %c0_21] : memref<3x128x128xf32, #tpu.memory_space<vmem>>, vector<1x128x128xf32>
    %36 = vector.shape_cast %35 : vector<1x128x128xf32> to vector<128x128xf32>
    %c1_22 = arith.constant 1 : index
    %c0_23 = arith.constant 0 : index
    %c0_24 = arith.constant 0 : index
    %37 = vector.load %arg6[%c1_22, %c0_23, %c0_24] : memref<3x1x128xf32, #tpu.memory_space<vmem>>, vector<1x1x128xf32>
    %38 = vector.shape_cast %37 : vector<1x1x128xf32> to vector<1x128xf32>
    %39 = vector.shape_cast %34 : vector<2x8x128xf32> to vector<16x128xf32>
    %cst_25 = arith.constant dense<0.000000e+00> : vector<16x128xf32>
    %40 = tpu.matmul %39, %36, %cst_25 {dimension_numbers = #tpu.dot_dimension_numbers<[1], [0], [0], [1], [0, 0, 1, 1], [], []>} : vector<16x128xf32>, vector<128x128xf32>, vector<16x128xf32> -> vector<16x128xf32>
    %41 = vector.shape_cast %40 : vector<16x128xf32> to vector<2x8x128xf32>
    %42 = vector.broadcast %13 : vector<2x8x1xf32> to vector<2x8x128xf32>
    %43 = arith.mulf %42, %41 : vector<2x8x128xf32>
    "tpu.trace_start"() <{level = 10 : i32, message = "bnm,bmd->bnd"}> : () -> ()
    %cst_26 = arith.constant dense<0.000000e+00> : vector<2x8x128xf32>
    %44 = tpu.matmul %1, %43, %cst_26 {dimension_numbers = #tpu.dot_dimension_numbers<[2], [1], [1], [2], [0, 0, 0, 1, 1, 2], [0], [0]>} : vector<2x8x8xf32>, vector<2x8x128xf32>, vector<2x8x128xf32> -> vector<2x8x128xf32>
    "tpu.trace_stop"() : () -> ()
    %45 = vector.broadcast %13 : vector<2x8x1xf32> to vector<2x8x128xf32>
    %46 = arith.mulf %45, %44 : vector<2x8x128xf32>
    %47 = vector.broadcast %14 : vector<2x8x1xf32> to vector<2x8x128xf32>
    %48 = arith.mulf %47, %41 : vector<2x8x128xf32>
    %49 = arith.addf %46, %48 : vector<2x8x128xf32>
    %50 = vector.shape_cast %38 : vector<1x128xf32> to vector<1x1x128xf32>
    %51 = vector.broadcast %50 : vector<1x1x128xf32> to vector<2x8x128xf32>
    %52 = arith.addf %49, %51 : vector<2x8x128xf32>
    %cst_27 = arith.constant 0.000000e+00 : f32
    %53 = vector.broadcast %cst_27 : f32 to vector<2x8x128xf32>
    %54 = arith.maximumf %52, %53 : vector<2x8x128xf32>
    %c2 = arith.constant 2 : index
    %c0_28 = arith.constant 0 : index
    %c0_29 = arith.constant 0 : index
    %55 = vector.load %arg5[%c2, %c0_28, %c0_29] : memref<3x128x128xf32, #tpu.memory_space<vmem>>, vector<1x128x128xf32>
    %56 = vector.shape_cast %55 : vector<1x128x128xf32> to vector<128x128xf32>
    %c2_30 = arith.constant 2 : index
    %c0_31 = arith.constant 0 : index
    %c0_32 = arith.constant 0 : index
    %57 = vector.load %arg6[%c2_30, %c0_31, %c0_32] : memref<3x1x128xf32, #tpu.memory_space<vmem>>, vector<1x1x128xf32>
    %58 = vector.shape_cast %57 : vector<1x1x128xf32> to vector<1x128xf32>
    %59 = vector.shape_cast %54 : vector<2x8x128xf32> to vector<16x128xf32>
    %cst_33 = arith.constant dense<0.000000e+00> : vector<16x128xf32>
    %60 = tpu.matmul %59, %56, %cst_33 {dimension_numbers = #tpu.dot_dimension_numbers<[1], [0], [0], [1], [0, 0, 1, 1], [], []>} : vector<16x128xf32>, vector<128x128xf32>, vector<16x128xf32> -> vector<16x128xf32>
    %61 = vector.shape_cast %60 : vector<16x128xf32> to vector<2x8x128xf32>
    %62 = vector.broadcast %13 : vector<2x8x1xf32> to vector<2x8x128xf32>
    %63 = arith.mulf %62, %61 : vector<2x8x128xf32>
    "tpu.trace_start"() <{level = 10 : i32, message = "bnm,bmd->bnd"}> : () -> ()
    %cst_34 = arith.constant dense<0.000000e+00> : vector<2x8x128xf32>
    %64 = tpu.matmul %1, %63, %cst_34 {dimension_numbers = #tpu.dot_dimension_numbers<[2], [1], [1], [2], [0, 0, 0, 1, 1, 2], [0], [0]>} : vector<2x8x8xf32>, vector<2x8x128xf32>, vector<2x8x128xf32> -> vector<2x8x128xf32>
    "tpu.trace_stop"() : () -> ()
    %65 = vector.broadcast %13 : vector<2x8x1xf32> to vector<2x8x128xf32>
    %66 = arith.mulf %65, %64 : vector<2x8x128xf32>
    %67 = vector.broadcast %14 : vector<2x8x1xf32> to vector<2x8x128xf32>
    %68 = arith.mulf %67, %61 : vector<2x8x128xf32>
    %69 = arith.addf %66, %68 : vector<2x8x128xf32>
    %70 = vector.shape_cast %58 : vector<1x128xf32> to vector<1x1x128xf32>
    %71 = vector.broadcast %70 : vector<1x1x128xf32> to vector<2x8x128xf32>
    %72 = arith.addf %69, %71 : vector<2x8x128xf32>
    %cst_35 = arith.constant dense<0.000000e+00> : vector<2x128xf32>
    %73 = vector.multi_reduction <add>, %72, %cst_35 [1] : vector<2x8x128xf32> to vector<2x128xf32>
    %cst_36 = arith.constant 8.000000e+00 : f32
    %74 = vector.broadcast %cst_36 : f32 to vector<2x128xf32>
    %75 = arith.divf %73, %74 : vector<2x128xf32>
    %c0_37 = arith.constant 0 : index
    %c0_38 = arith.constant 0 : index
    %76 = vector.load %arg7[%c0_37, %c0_38] : memref<1x128xf32, #tpu.memory_space<vmem>>, vector<1x128xf32>
    %77 = vector.shape_cast %76 : vector<1x128xf32> to vector<1x1x128xf32>
    %78 = vector.broadcast %77 : vector<1x1x128xf32> to vector<2x8x128xf32>
    %79 = arith.mulf %72, %78 : vector<2x8x128xf32>
    %cst_39 = arith.constant dense<0.000000e+00> : vector<2x8xf32>
    %80 = vector.multi_reduction <add>, %79, %cst_39 [2] : vector<2x8x128xf32> to vector<2x8xf32>
    %81 = vector.shape_cast %80 : vector<2x8xf32> to vector<2x8x1xf32>
    %c0_40 = arith.constant 0 : index
    %c0_41 = arith.constant 0 : index
    %82 = memref.load %arg8[%c0_40, %c0_41] : memref<1x1xf32, #tpu.memory_space<smem>>
    %83 = vector.broadcast %82 : f32 to vector<2x8x1xf32>
    %84 = arith.addf %81, %83 : vector<2x8x1xf32>
    %cst_42 = arith.constant dense<0xFF800000> : vector<2x1xf32>
    %85 = vector.multi_reduction <maximumf>, %84, %cst_42 [1] : vector<2x8x1xf32> to vector<2x1xf32>
    %86 = vector.shape_cast %85 : vector<2x1xf32> to vector<2x1x1xf32>
    %87 = vector.broadcast %86 : vector<2x1x1xf32> to vector<2x8x1xf32>
    %88 = arith.subf %84, %87 : vector<2x8x1xf32>
    %89 = math.exp %88 : vector<2x8x1xf32>
    %cst_43 = arith.constant dense<0.000000e+00> : vector<2x1xf32>
    %90 = vector.multi_reduction <add>, %89, %cst_43 [1] : vector<2x8x1xf32> to vector<2x1xf32>
    %91 = vector.shape_cast %90 : vector<2x1xf32> to vector<2x1x1xf32>
    %92 = tpu.reciprocal %91 : vector<2x1x1xf32> -> vector<2x1x1xf32>
    %93 = vector.broadcast %92 : vector<2x1x1xf32> to vector<2x8x1xf32>
    %94 = arith.mulf %89, %93 : vector<2x8x1xf32>
    %95 = vector.broadcast %94 : vector<2x8x1xf32> to vector<2x8x128xf32>
    %96 = arith.mulf %95, %72 : vector<2x8x128xf32>
    %cst_44 = arith.constant dense<0.000000e+00> : vector<2x128xf32>
    %97 = vector.multi_reduction <add>, %96, %cst_44 [1] : vector<2x8x128xf32> to vector<2x128xf32>
    %98 = arith.addf %75, %97 : vector<2x128xf32>
    %c0_45 = arith.constant 0 : index
    %c0_46 = arith.constant 0 : index
    %c0_47 = arith.constant 0 : index
    %99 = vector.load %arg9[%c0_45, %c0_46, %c0_47] : memref<2x8x128xf32, #tpu.memory_space<vmem>>, vector<2x8x128xf32>
    tpu.vector_store %arg9[%c0_45, %c0_46, %c0_47], %72 {strides = array<i32>} : memref<2x8x128xf32, #tpu.memory_space<vmem>>, vector<2x8x128xf32>,
    %100 = vector.shape_cast %98 : vector<2x128xf32> to vector<2x1x128xf32>
    %c0_48 = arith.constant 0 : index
    %c0_49 = arith.constant 0 : index
    %c0_50 = arith.constant 0 : index
    %101 = vector.load %arg10[%c0_48, %c0_49, %c0_50] : memref<2x1x128xf32, #tpu.memory_space<vmem>>, vector<2x1x128xf32>
    tpu.vector_store %arg10[%c0_48, %c0_49, %c0_50], %100 {strides = array<i32>} : memref<2x1x128xf32, #tpu.memory_space<vmem>>, vector<2x1x128xf32>,
    %102 = vector.shape_cast %98 : vector<2x128xf32> to vector<2x1x128xf32>
    %103 = vector.broadcast %102 : vector<2x1x128xf32> to vector<2x8x128xf32>
    %104 = arith.addf %72, %103 : vector<2x8x128xf32>
    %105 = arith.addf %104, %8 : vector<2x8x128xf32>
    %c0_51 = arith.constant 0 : index
    %c0_52 = arith.constant 0 : index
    %c0_53 = arith.constant 0 : index
    %106 = vector.load %arg11[%c0_51, %c0_52, %c0_53] : memref<2x8x128xf32, #tpu.memory_space<vmem>>, vector<2x8x128xf32>
    tpu.vector_store %arg11[%c0_51, %c0_52, %c0_53], %105 {strides = array<i32>} : memref<2x8x128xf32, #tpu.memory_space<vmem>>, vector<2x8x128xf32>,
    %c0_54 = arith.constant 0 : index
    %c0_55 = arith.constant 0 : index
    %c0_56 = arith.constant 0 : index
    %107 = vector.load %arg12[%c0_54, %c0_55, %c0_56] : memref<2x8x128xf32, #tpu.memory_space<vmem>>, vector<2x8x128xf32>
    tpu.vector_store %arg12[%c0_54, %c0_55, %c0_56], %8 {strides = array<i32>} : memref<2x8x128xf32, #tpu.memory_space<vmem>>, vector<2x8x128xf32>,
    return
  }
  func.func @transform_0(%arg0: i32) -> (i32, i32, i32) {
    %c0_i32 = arith.constant 0 : i32
    %c0_i32_0 = arith.constant 0 : i32
    %c0_i32_1 = arith.constant 0 : i32
    return %arg0, %c0_i32, %c0_i32_0 : i32, i32, i32
  }
  func.func @transform_1(%arg0: i32) -> (i32, i32, i32) {
    %c0_i32 = arith.constant 0 : i32
    %c0_i32_0 = arith.constant 0 : i32
    %c0_i32_1 = arith.constant 0 : i32
    return %arg0, %c0_i32, %c0_i32_0 : i32, i32, i32
  }
  func.func @transform_2(%arg0: i32) -> (i32, i32) {
    %c0_i32 = arith.constant 0 : i32
    %c0_i32_0 = arith.constant 0 : i32
    %c0_i32_1 = arith.constant 0 : i32
    return %c0_i32, %c0_i32_0 : i32, i32
  }
  func.func @transform_3(%arg0: i32) -> (i32, i32) {
    %c0_i32 = arith.constant 0 : i32
    %c0_i32_0 = arith.constant 0 : i32
    %c0_i32_1 = arith.constant 0 : i32
    return %c0_i32, %c0_i32_0 : i32, i32
  }
  func.func @transform_4(%arg0: i32) -> (i32, i32, i32) {
    %c0_i32 = arith.constant 0 : i32
    %c0_i32_0 = arith.constant 0 : i32
    %c0_i32_1 = arith.constant 0 : i32
    %c0_i32_2 = arith.constant 0 : i32
    return %c0_i32, %c0_i32_0, %c0_i32_1 : i32, i32, i32
  }
  func.func @transform_5(%arg0: i32) -> (i32, i32, i32) {
    %c0_i32 = arith.constant 0 : i32
    %c0_i32_0 = arith.constant 0 : i32
    %c0_i32_1 = arith.constant 0 : i32
    %c0_i32_2 = arith.constant 0 : i32
    return %c0_i32, %c0_i32_0, %c0_i32_1 : i32, i32, i32
  }
  func.func @transform_6(%arg0: i32) -> (i32, i32) {
    %c0_i32 = arith.constant 0 : i32
    %c0_i32_0 = arith.constant 0 : i32
    %c0_i32_1 = arith.constant 0 : i32
    return %c0_i32, %c0_i32_0 : i32, i32
  }
  func.func @transform_7(%arg0: i32) -> (i32, i32) {
    %c0_i32 = arith.constant 0 : i32
    %c0_i32_0 = arith.constant 0 : i32
    %c0_i32_1 = arith.constant 0 : i32
    return %c0_i32, %c0_i32_0 : i32, i32
  }
  func.func @transform_8(%arg0: i32) -> (i32, i32, i32) {
    %c0_i32 = arith.constant 0 : i32
    %c0_i32_0 = arith.constant 0 : i32
    %c0_i32_1 = arith.constant 0 : i32
    return %arg0, %c0_i32, %c0_i32_0 : i32, i32, i32
  }
  func.func @transform_9(%arg0: i32) -> (i32, i32, i32) {
    %c0_i32 = arith.constant 0 : i32
    %c0_i32_0 = arith.constant 0 : i32
    %c0_i32_1 = arith.constant 0 : i32
    return %arg0, %c0_i32, %c0_i32_0 : i32, i32, i32
  }
  func.func @transform_10(%arg0: i32) -> (i32, i32, i32) {
    %c0_i32 = arith.constant 0 : i32
    %c0_i32_0 = arith.constant 0 : i32
    %c0_i32_1 = arith.constant 0 : i32
    return %arg0, %c0_i32, %c0_i32_0 : i32, i32, i32
  }
  func.func @transform_11(%arg0: i32) -> (i32, i32, i32) {
    %c0_i32 = arith.constant 0 : i32
    %c0_i32_0 = arith.constant 0 : i32
    %c0_i32_1 = arith.constant 0 : i32
    return %arg0, %c0_i32, %c0_i32_0 : i32, i32, i32
  }
}

</mosaic_0001>

<bundles_post_ra>
// kernel: tpu_custom_call.1
= control target key start
LH: loop header
LB: loop body
LE: loop exit
PB: predicated region body
PF: predicated region fallthrough
CT: control target
= control target key end

     0   :  { %18 = vsyncpa [#allocation4], 0  ;;  %s1810_s0 = inlined_call_operand.vmem [shape: f32[2,8,4], index: 0, kind: input, shape index: {}]   ;;  %s1811_s1 = inlined_call_operand.vmem [shape: f32[2,8,8], index: 1, kind: input, shape index: {}]   ;;  %s1812_s2 = inlined_call_operand.vmem [shape: f32[4,128], index: 2, kind: input, shape index: {}]   ;;  %s1813_s3 = inlined_call_operand.vmem [shape: f32[1,128], index: 3, kind: input, shape index: {}]   ;;  %s1814_s4 = inlined_call_operand.hbm [shape: f32[3,128,128], index: 4, kind: input, shape index: {}]   ;;  %s1815_s5 = inlined_call_operand.vmem [shape: f32[3,1,128], index: 5, kind: input, shape index: {}]   ;;  %s1816_s6 = inlined_call_operand.vmem [shape: f32[1,128], index: 6, kind: input, shape index: {}]   ;;  %s1817_s7 = inlined_call_operand.<no memory space> [shape: f32[1,1], index: 7, kind: input, shape index: {}]   ;;  %s1818_s8 = inlined_call_operand.hbm [shape: f32[2,8,128], index: 8, kind: output, shape index: {0}]   ;;  %s1819_s9 = inlined_call_operand.hbm [shape: f32[2,1,128], index: 9, kind: output, shape index: {1}]   ;;  %s1820_s10 = inlined_call_operand.hbm [shape: f32[2,8,128], index: 10, kind: output, shape index: {2}]   ;;  %s1821_s11 = inlined_call_operand.hbm [shape: f32[2,8,128], index: 11, kind: output, shape index: {3}]  }
   0x1   :  { %19 = vsyncpa [#allocation5], 0 }
   0x2   :  { %20 = vsyncpa [#allocation8], 0 }
   0x3   :  { %21 = vsyncpa [#allocation11], 0  ;;  %s1540_s17 = smov [#allocation3]   ;;  %s1422_s21 = scalar_lea.hbm %s1814_s4, 6144 }
   0x4   :  { %s35_s18 = sshll.u32 %s1540_s17, 4  ;;  %p1423_p0 = scmp.ne.s32.totalorder %s1814_s4, %s1422_s21  ;;  %s36_s18 = int_to_ptr.vmem [resolvable:$true] %s35_s18 }
   0x5   :  { %p1426_p1 = scmp.lt.u32.totalorder %s1422_s21, %s1814_s4 }
   0x7   :  { %p1428_p2 = pnand %p1426_p1, %p1423_p0 }
   0x9   :  { %1431 = shalt.err (!%p1428_p2)
}
   0xa   :  { %s1432_s26 = scalar_lea.vmem %s36_s18, 6144  ;;  %p1437_p4 = scmp.lt.s32.totalorder %s36_s18, %s36_s18 }
   0xb   :  { %p1433_p3 = scmp.ne.s32.totalorder %s36_s18, %s1432_s26  ;;  %p1438_p5 = scmp.lt.s32.totalorder %s1432_s26, %s1432_s26 }
   0xd   :  { %p1439_p6 = por %p1438_p5, %p1437_p4 }
   0xf   :  { %p1440_p7 = pnand %p1439_p6, %p1433_p3 }
  0x11   :  { %1443 = shalt.err (!%p1440_p7)
}
  0x12   :  { %s1541_s27 = smov 128   ;;  %s1542_s28 = smov 8  }
  0x13   :  { %41 = dma.hbm_to_vmem [thread:$0]  %s1814_s4, 6144, %s36_s18, [#allocation4], %s1541_s27, %s1541_s27, %s1542_s28  }
  0x14   :  { %1532 = dma.done.wait [#allocation4], 6144  }
  0x15   :  { %1533 = vsyncadd [#allocation4], 4294961152  ;;  %vm70_vm0 = vcmask 1043456   ;;  %vm63_vm1 = vcmask 31744   ;;  %v55_v0 = vld [vmem:[%s1812_s2] sm:$0xf] }
  0x16   :  { %v51_v1 = vld [vmem:[%s1810_s0] sm:$0xff]  ;;  %v52_v2 = vld [vmem:[%s1810_s0 + $0x8] sm:$0xff]  ;;  %1163 = vmatprep.subr.msk.mxu0 %vm70_vm0, %v55_v0  ;;  %v164_v5 = vld [vmem:[#allocation3 + $0x10] sm:$0xff]  ;;  %vm149_vm2 = vcmask 64512   ;;  %v1543_v36 = vmov 0.0   ;;  %vm1544_vm3 = vmmov 0  }
  0x17   :  { %1165 = vmatprep.mubr.msk.f32.mxu0 %vm63_vm1, %v51_v1  ;;  %v162_v3 = vld [vmem:[#allocation3] sm:$0xff]  ;;  %v163_v4 = vld [vmem:[#allocation3 + $0x8] sm:$0xff]  ;;  %1164 = vmatpush3.msk.msra.mxu0 %vm70_vm0, %v55_v0  ;;  %v165_v7 = vld [vmem:[#allocation3 + $0x18] sm:$0xff] }
  0x18   :  { %v1303_v6 = vpack.c.bf16 %v163_v4, %v162_v3  ;;  %1166 = vmatmul.mubr.msk.f32.vlgmr.msra.gmra.mrb[0].mxu0 %vm63_vm1, %v52_v2  ;;  %v1307_v8 = vpack.c.bf16 %v165_v7, %v164_v5  ;;  %v166_v9 = vld [vmem:[#allocation3 + $0x20] sm:$0xff]  ;;  %v167_v10 = vld [vmem:[#allocation3 + $0x28] sm:$0xff]  ;;  %v168_v12 = vld [vmem:[#allocation3 + $0x30] sm:$0xff]  ;;  %1203 = vmatprep.subr.mxu0 %v1543_v36 }
  0x19   :  { %v1311_v11 = vpack.c.bf16 %v167_v10, %v166_v9  ;;  %v169_v13 = vld [vmem:[#allocation3 + $0x38] sm:$0xff]  ;;  %v170_v15 = vld [vmem:[#allocation3 + $0x40] sm:$0xff]  ;;  %v171_v16 = vld [vmem:[#allocation3 + $0x48] sm:$0xff]  ;;  %1205 = vmatprep.mubr.msk.f32.mxu0 %vm1544_vm3, %v1543_v36 }
  0x1a   :  { %1304 = vmatprep.subr.bf16.mxu1 %v1303_v6  ;;  %v1315_v14 = vpack.c.bf16 %v169_v13, %v168_v12  ;;  %v1319_v17 = vpack.c.bf16 %v171_v16, %v170_v15  ;;  %v172_v18 = vld [vmem:[#allocation3 + $0x50] sm:$0xff]  ;;  %v173_v19 = vld [vmem:[#allocation3 + $0x58] sm:$0xff]  ;;  %v174_v21 = vld [vmem:[#allocation3 + $0x60] sm:$0xff] }
  0x1b   :  { %1306 = vmatpush3.bf16.msra.mxu1 %v1303_v6  ;;  %v1323_v20 = vpack.c.bf16 %v173_v19, %v172_v18  ;;  %v175_v22 = vld [vmem:[#allocation3 + $0x68] sm:$0xff]  ;;  %v176_v24 = vld [vmem:[#allocation3 + $0x70] sm:$0xff]  ;;  %v177_v25 = vld [vmem:[#allocation3 + $0x78] sm:$0xff] }
  0x1c   :  { %1308 = vmatprep.subr.bf16.mxu1 %v1307_v8  ;;  %v1327_v23 = vpack.c.bf16 %v175_v22, %v174_v21  ;;  %v1331_v26 = vpack.c.bf16 %v177_v25, %v176_v24  ;;  %v1638_v27 = vld [vmem:[%s1811_s1] sm:$0xff]  ;;  %v1643_v28 = vld [vmem:[%s1811_s1 + $0x8] sm:$0xff]  ;;  %v421_v50 = vld [vmem:[#allocation3 + $0x90] sm:$0xff] }
  0x1d   :  { %v150_v29 = vsel %vm149_vm2, %v1638_v27, 0.0  ;;  %v153_v30 = vsel %vm149_vm2, %v1643_v28, 0.0  ;;  %v1078_v31 = vld [vmem:[%s1813_s3] ss:$0 sm:$0xff]  ;;  %v420_v43 = vld [vmem:[#allocation3 + $0x88] sm:$0xff]  ;;  %v422_v51 = vld [vmem:[#allocation3 + $0x98] sm:$0xff] }
  0x1e   :  { %151 = vadd.xlane.f32.xlu0 %v150_v29  ;;  %v419_v42 = vld [vmem:[#allocation3 + $0x80] sm:$0xff]  ;;  %v1339_v52 = vpack.c.bf16 %v422_v51, %v421_v50  ;;  %v424_v54 = vld [vmem:[#allocation3 + $0xa8] sm:$0xff]  ;;  %v425_v56 = vld [vmem:[#allocation3 + $0xb0] sm:$0xff] }
  0x1f   :  { %1310 = vmatpush3.bf16.msra.mxu1 %v1307_v8  ;;  %v1335_v48 = vpack.c.bf16 %v420_v43, %v419_v42  ;;  %v423_v53 = vld [vmem:[#allocation3 + $0xa0] sm:$0xff]  ;;  %v426_v57 = vld [vmem:[#allocation3 + $0xb8] sm:$0xff]  ;;  %v428_v60 = vld [vmem:[#allocation3 + $0xc8] sm:$0xff] }
  0x20   :  { %1312 = vmatprep.subr.bf16.mxu1 %v1311_v11  ;;  %v1343_v55 = vpack.c.bf16 %v424_v54, %v423_v53  ;;  %v1347_v58 = vpack.c.bf16 %v426_v57, %v425_v56  ;;  %v427_v59 = vld [vmem:[#allocation3 + $0xc0] sm:$0xff]  ;;  %v429_v62 = vld [vmem:[#allocation3 + $0xd0] sm:$0xff]  ;;  %v430_v63 = vld [vmem:[#allocation3 + $0xd8] sm:$0xff] }
  0x21   :  { %v1351_v61 = vpack.c.bf16 %v428_v60, %v427_v59  ;;  %v1355_v0 = vpack.c.bf16 %v430_v63, %v429_v62  ;;  %v431_v1 = vld [vmem:[#allocation3 + $0xe0] sm:$0xff]  ;;  %v432_v2 = vld [vmem:[#allocation3 + $0xe8] sm:$0xff]  ;;  %v433_v4 = vld [vmem:[#allocation3 + $0xf0] sm:$0xff] }
  0x22   :  { %154 = vadd.xlane.f32.xlu0 %v153_v30  ;;  %v1359_v3 = vpack.c.bf16 %v432_v2, %v431_v1  ;;  %v434_v5 = vld [vmem:[#allocation3 + $0xf8] sm:$0xff]  ;;  %v1084_v13 = vld [vmem:[%s1815_s5] ss:$0 sm:$0xff]  ;;  %v672_v25 = vld [vmem:[#allocation3 + $0x108] sm:$0xff] }
  0x23   :  { %1314 = vmatpush3.bf16.msra.mxu1 %v1311_v11  ;;  %v1363_v6 = vpack.c.bf16 %v434_v5, %v433_v4  ;;  %v671_v24 = vld [vmem:[#allocation3 + $0x100] sm:$0xff]  ;;  %v674_v30 = vld [vmem:[#allocation3 + $0x118] sm:$0xff]  ;;  %v680_v42 = vld [vmem:[#allocation3 + $0x148] sm:$0xff] }
  0x24   :  { %1316 = vmatprep.subr.bf16.mxu1 %v1315_v14  ;;  %v1367_v29 = vpack.c.bf16 %v672_v25, %v671_v24  ;;  %v681_v50 = vld [vmem:[#allocation3 + $0x150] sm:$0xff]  ;;  %v682_v51 = vld [vmem:[#allocation3 + $0x158] sm:$0xff]  ;;  %v683_v53 = vld [vmem:[#allocation3 + $0x160] sm:$0xff] }
  0x25   :  { %v684_v54 = vld [vmem:[#allocation3 + $0x168] sm:$0xff]  ;;  %v685_v56 = vld [vmem:[#allocation3 + $0x170] sm:$0xff]  ;;  %v686_v57 = vld [vmem:[#allocation3 + $0x178] sm:$0xff] }
  0x26   :  { %v1088_v63 = vld [vmem:[%s1815_s5 + $0x1] ss:$0 sm:$0xff] }
  0x27   :  { %1318 = vmatpush3.bf16.msra.mxu1 %v1315_v14 }
  0x28   :  { %1320 = vmatprep.subr.bf16.mxu1 %v1319_v17 }
  0x2b   :  { %1322 = vmatpush3.bf16.msra.mxu1 %v1319_v17 }
  0x2c   :  { %1324 = vmatprep.subr.bf16.mxu1 %v1323_v20 }
  0x2f   :  { %1326 = vmatpush3.bf16.msra.mxu1 %v1323_v20 }
  0x30   :  { %1328 = vmatprep.subr.bf16.mxu1 %v1327_v23 }
  0x33   :  { %1330 = vmatpush3.bf16.msra.mxu1 %v1327_v23 }
  0x34   :  { %1332 = vmatprep.subr.bf16.mxu1 %v1331_v26 }
  0x37   :  { %1334 = vmatpush3.bf16.msra.mxu1 %v1331_v26  ;;  %v673_v26 = vld [vmem:[#allocation3 + $0x110] sm:$0xff] }
  0x38   :  { %1368 = vmatprep.subr.bf16.mxu1 %v1367_v29 }
  0xab   :  { %v152_v37 = vpop.xlane.xlu0 %151 }
  0xac   :  { %v156_v39 = vadd.f32 1.0, %v152_v37 }
  0xae   :  { %1410 = vrsqrt.f32 %v156_v39  ;;  %v678_v39 = vld [vmem:[#allocation3 + $0x138] sm:$0xff] }
  0xaf   :  { %v155_v38 = vpop.xlane.xlu0 %154 }
  0xb0   :  { %v157_v40 = vadd.f32 1.0, %v155_v38  ;;  %v677_v38 = vld [vmem:[#allocation3 + $0x130] sm:$0xff] }
  0xb2   :  { %1412 = vrsqrt.f32 %v157_v40  ;;  %v1379_v40 = vpack.c.bf16 %v678_v39, %v677_v38 }
  0xb8   :  { %v1663_v44 = vpop.eup %1410 }
  0xb9   :  { %v1679_v7 = vmul.f32 %v1663_v44, %v1663_v44 }
  0xbc   :  { %v1666_v47 = vpop.eup %1412 }
  0xbd   :  { %v1683_v9 = vmul.f32 %v1666_v47, %v1666_v47 }
  0xeb   :  { %v1167_v32 = vpop.f32.mrb[0].mxu0 }
  0xec   :  { %v1652_v33 = vadd.f32 %v1167_v32, %v1078_v31  ;;  %v140_v34 = vpop.f32.mrb[1].mxu0  ;;  %v675_v32 = vld [vmem:[#allocation3 + $0x120] sm:$0xff] }
  0xed   :  { %v1654_v35 = vadd.f32 %v1078_v31, %v140_v34  ;;  %v1371_v31 = vpack.c.bf16 %v674_v30, %v673_v26  ;;  %v676_v34 = vld [vmem:[#allocation3 + $0x128] sm:$0xff] }
  0xee   :  { %1013 = vst [vmem:[#allocation10 + $0x8] sm:$0xff] %v1652_v33  ;;  %v1375_v37 = vpack.c.bf16 %v676_v34, %v675_v32 }
  0xef   :  { %1012 = vst [vmem:[#allocation10] sm:$0xff] %v1654_v35  ;;  %1200 = vmatprep.mubr.f32.mxu1 %v1654_v35 }
  0xf0   :  { %1201 = vmatmul.mubr.f32.vlgmr.msra.gmra.mrb[0].mxu1 %v1652_v33 }
  0xf1   :  { %1370 = vmatpush3.bf16.msra.mxu1 %v1367_v29 }
  0xf2   :  { %1372 = vmatprep.subr.bf16.mxu1 %v1371_v31 }
  0xf5   :  { %1374 = vmatpush3.bf16.msra.mxu1 %v1371_v31 }
  0xf6   :  { %1376 = vmatprep.subr.bf16.mxu1 %v1375_v37 }
  0xf9   :  { %1378 = vmatpush3.bf16.msra.mxu1 %v1375_v37 }
  0xfa   :  { %1380 = vmatprep.subr.bf16.mxu1 %v1379_v40 }
  0xfd   :  { %1382 = vmatpush3.bf16.msra.mxu1 %v1379_v40 }
 0x1c3   :  { %v1202_v41 = vpop.f32.mrb[0].mxu1 }
 0x1c4   :  { %v245_v45 = vpop.f32.mrb[1].mxu1  ;;  %v255_v49 = vmul.f32 %v1666_v47, %v1202_v41  ;;  %v405_v16 = vmul.f32 %v1202_v41, %v1683_v9  ;;  %v679_v41 = vld [vmem:[#allocation3 + $0x140] sm:$0xff] }
 0x1c5   :  { %v254_v46 = vmul.f32 %v1663_v44, %v245_v45  ;;  %v404_v10 = vmul.f32 %v245_v45, %v1679_v7  ;;  %v1383_v43 = vpack.c.bf16 %v680_v42, %v679_v41 }
 0x1c7   :  { %1204 = vmatpush3.msra.mxu0 %v254_v46  ;;  %1384 = vmatprep.subr.bf16.mxu1 %v1383_v43 }
 0x1c8   :  { %1206 = vmatmul.mubr.msk.f32.vlgmr.msra.gmra.mrb[2].mxu0 %vm149_vm2, %v1638_v27  ;;  %1208 = vmatprep.subr.mxu0 %v1543_v36 }
 0x1c9   :  { %1209 = vmatpush3.msra.mxu0 %v255_v49  ;;  %1210 = vmatprep.mubr.msk.f32.mxu0 %vm1544_vm3, %v1543_v36 }
 0x1ca   :  { %1336 = vmatprep.subr.bf16.mxu0 %v1335_v48  ;;  %1386 = vmatpush3.bf16.msra.mxu1 %v1383_v43 }
 0x1cc   :  { %1211 = vmatmul.mubr.msk.f32.vlgmr.msra.gmra.mrb[4].mxu0 %vm149_vm2, %v1643_v28 }
 0x1cd   :  { %1338 = vmatpush3.bf16.msra.mxu0 %v1335_v48 }
 0x1ce   :  { %1340 = vmatprep.subr.bf16.mxu0 %v1339_v52 }
 0x1d1   :  { %1342 = vmatpush3.bf16.msra.mxu0 %v1339_v52  ;;  %v1387_v52 = vpack.c.bf16 %v682_v51, %v681_v50 }
 0x1d2   :  { %1344 = vmatprep.subr.bf16.mxu0 %v1343_v55 }
 0x1d3   :  { %1388 = vmatprep.subr.bf16.mxu1 %v1387_v52 }
 0x1d4   :  { %1390 = vmatpush3.bf16.msra.mxu1 %v1387_v52 }
 0x1d5   :  { %1346 = vmatpush3.bf16.msra.mxu0 %v1343_v55  ;;  %v1391_v55 = vpack.c.bf16 %v684_v54, %v683_v53 }
 0x1d6   :  { %1348 = vmatprep.subr.bf16.mxu0 %v1347_v58 }
 0x1d7   :  { %1392 = vmatprep.subr.bf16.mxu1 %v1391_v55 }
 0x1d8   :  { %1394 = vmatpush3.bf16.msra.mxu1 %v1391_v55 }
 0x1d9   :  { %1350 = vmatpush3.bf16.msra.mxu0 %v1347_v58  ;;  %v1395_v58 = vpack.c.bf16 %v686_v57, %v685_v56 }
 0x1da   :  { %1352 = vmatprep.subr.bf16.mxu0 %v1351_v61 }
 0x1db   :  { %1396 = vmatprep.subr.bf16.mxu1 %v1395_v58 }
 0x1dc   :  { %1398 = vmatpush3.bf16.msra.mxu1 %v1395_v58 }
 0x1dd   :  { %1354 = vmatpush3.bf16.msra.mxu0 %v1351_v61 }
 0x1de   :  { %1356 = vmatprep.subr.bf16.mxu0 %v1355_v0 }
 0x1e1   :  { %1358 = vmatpush3.bf16.msra.mxu0 %v1355_v0 }
 0x1e2   :  { %1360 = vmatprep.subr.bf16.mxu0 %v1359_v3 }
 0x1e5   :  { %1362 = vmatpush3.bf16.msra.mxu0 %v1359_v3 }
 0x1e6   :  { %1364 = vmatprep.subr.bf16.mxu0 %v1363_v6 }
 0x1e9   :  { %1366 = vmatpush3.bf16.msra.mxu0 %v1363_v6 }
 0x1ea   :  { %1248 = vmatprep.subr.mxu0 %v1543_v36 }
 0x29b   :  { %v325_v8 = vpop.f32.mrb[2].mxu0 }
 0x29c   :  { %v402_v11 = vmul.f32 %v1663_v44, %v325_v8  ;;  %v1207_v12 = vpop.f32.mrb[3].mxu0 }
 0x29e   :  { %v406_v14 = vadd.f32 %v404_v10, %v402_v11 }
 0x29f   :  { %v398_v15 = vpop.f32.mrb[4].mxu0 }
 0x2a0   :  { %v403_v17 = vmul.f32 %v1666_v47, %v398_v15  ;;  %v1212_v18 = vpop.f32.mrb[5].mxu0  ;;  %v414_v19 = vadd.f32 %v1084_v13, %v406_v14 }
 0x2a2   :  { %v407_v20 = vadd.f32 %v405_v16, %v403_v17  ;;  %v416_v21 = vmax.f32 %v414_v19, 0.0 }
 0x2a4   :  { %v415_v22 = vadd.f32 %v1084_v13, %v407_v20  ;;  %1245 = vmatprep.mubr.f32.mxu0 %v416_v21  ;;  %v1092_v20 = vld [vmem:[%s1815_s5 + $0x2] ss:$0 sm:$0xff]  ;;  %s1545_s5 = smov [#allocation6]  }
 0x2a6   :  { %v417_v23 = vmax.f32 %v415_v22, 0.0  ;;  %v1093_v22 = vld [vmem:[%s1816_s6] ss:$0 sm:$0xff]  ;;  %s1019_s6 = sshll.u32 %s1545_s5, 4  ;;  %s1020_s6 = int_to_ptr.vmem [resolvable:$true] %s1019_s6 }
 0x2a7   :  { %s1444_s29 = scalar_lea.vmem %s1020_s6, 256  ;;  %p1449_p9 = scmp.lt.s32.totalorder %s1020_s6, %s1020_s6 }
 0x2a8   :  { %1246 = vmatmul.mubr.f32.vlgmr.msra.gmra.mrb[6].mxu0 %v417_v23  ;;  %p1445_p8 = scmp.ne.s32.totalorder %s1020_s6, %s1444_s29  ;;  %p1450_p10 = scmp.lt.s32.totalorder %s1444_s29, %s1444_s29 }
 0x2a9   :  { %1250 = vmatprep.mubr.msk.f32.mxu0 %vm1544_vm3, %v1543_v36 }
 0x2aa   :  { %p1451_p11 = por %p1450_p10, %p1449_p9 }
 0x2ac   :  { %p1452_p12 = pnand %p1451_p11, %p1445_p8 }
 0x37b   :  { %v1247_v45 = vpop.f32.mrb[6].mxu0 }
 0x37c   :  { %v503_v46 = vpop.f32.mrb[7].mxu0  ;;  %v513_v49 = vmul.f32 %v1666_v47, %v1247_v45  ;;  %v657_v2 = vmul.f32 %v1247_v45, %v1683_v9 }
 0x37d   :  { %v512_v48 = vmul.f32 %v1663_v44, %v503_v46  ;;  %v656_v60 = vmul.f32 %v503_v46, %v1679_v7 }
 0x37f   :  { %1249 = vmatpush3.msra.mxu0 %v512_v48 }
 0x380   :  { %1251 = vmatmul.mubr.msk.f32.vlgmr.msra.gmra.mrb[8].mxu0 %vm149_vm2, %v1638_v27  ;;  %1253 = vmatprep.subr.mxu0 %v1543_v36 }
 0x381   :  { %1254 = vmatpush3.msra.mxu0 %v513_v49  ;;  %1255 = vmatprep.mubr.msk.f32.mxu0 %vm1544_vm3, %v1543_v36 }
 0x382   :  { %1293 = vmatprep.subr.mxu0 %v1543_v36 }
 0x384   :  { %1256 = vmatmul.mubr.msk.f32.vlgmr.msra.gmra.mrb[10].mxu0 %vm149_vm2, %v1643_v28 }
 0x385   :  { %1295 = vmatprep.mubr.msk.f32.mxu0 %vm1544_vm3, %v1543_v36 }
 0x453   :  { %v580_v59 = vpop.f32.mrb[8].mxu0 }
 0x454   :  { %v654_v61 = vmul.f32 %v1663_v44, %v580_v59  ;;  %v1252_v62 = vpop.f32.mrb[9].mxu0 }
 0x456   :  { %v658_v0 = vadd.f32 %v656_v60, %v654_v61 }
 0x457   :  { %v650_v1 = vpop.f32.mrb[10].mxu0 }
 0x458   :  { %v655_v3 = vmul.f32 %v1666_v47, %v650_v1  ;;  %v1257_v4 = vpop.f32.mrb[11].mxu0  ;;  %v666_v5 = vadd.f32 %v1088_v63, %v658_v0 }
 0x45a   :  { %v659_v6 = vadd.f32 %v657_v2, %v655_v3  ;;  %v668_v8 = vmax.f32 %v666_v5, 0.0 }
 0x45c   :  { %v667_v10 = vadd.f32 %v1088_v63, %v659_v6  ;;  %1290 = vmatprep.mubr.f32.mxu1 %v668_v8 }
 0x45e   :  { %v669_v11 = vmax.f32 %v667_v10, 0.0 }
 0x460   :  { %1291 = vmatmul.mubr.f32.vlgmr.msra.gmra.mrb[2].mxu1 %v669_v11 }
 0x533   :  { %v1292_v12 = vpop.f32.mrb[2].mxu1 }
 0x534   :  { %v755_v13 = vpop.f32.mrb[3].mxu1  ;;  %v765_v15 = vmul.f32 %v1666_v47, %v1292_v12 }
 0x535   :  { %v764_v14 = vmul.f32 %v1663_v44, %v755_v13  ;;  %v908_v17 = vmul.f32 %v755_v13, %v1679_v7 }
 0x537   :  { %1294 = vmatpush3.msra.mxu0 %v764_v14 }
 0x538   :  { %1296 = vmatmul.mubr.msk.f32.vlgmr.msra.gmra.mrb[12].mxu0 %vm149_vm2, %v1638_v27  ;;  %1298 = vmatprep.subr.mxu0 %v1543_v36 }
 0x539   :  { %1299 = vmatpush3.msra.mxu0 %v765_v15  ;;  %1300 = vmatprep.mubr.msk.f32.mxu0 %vm1544_vm3, %v1543_v36  ;;  %v909_v36 = vmul.f32 %v1292_v12, %v1683_v9 }
 0x53c   :  { %1301 = vmatmul.mubr.msk.f32.vlgmr.msra.gmra.mrb[14].mxu0 %vm149_vm2, %v1643_v28 }
 0x60b   :  { %v832_v16 = vpop.f32.mrb[12].mxu0 }
 0x60c   :  { %v906_v18 = vmul.f32 %v1663_v44, %v832_v16  ;;  %v1297_v19 = vpop.f32.mrb[13].mxu0 }
 0x60e   :  { %v910_v27 = vadd.f32 %v908_v17, %v906_v18 }
 0x60f   :  { %v902_v21 = vpop.f32.mrb[14].mxu0 }
 0x610   :  { %v1731_v23 = vadd.f32 %v1092_v20, %v910_v27  ;;  %v907_v28 = vmul.f32 %v1666_v47, %v902_v21  ;;  %v1302_v7 = vpop.f32.mrb[15].mxu0 }
 0x612   :  { %1002 = vst [vmem:[#allocation6] sm:$0xff] %v1731_v23  ;;  %v911_v44 = vadd.f32 %v909_v36, %v907_v28  ;;  %v942_v24 = vmul.f32 %v1093_v22, %v1731_v23 }
 0x614   :  { %v1736_v25 = vadd.f32 %v1092_v20, %v911_v44  ;;  %944 = vadd.xlane.f32.xlu1 %v942_v24 }
 0x616   :  { %1003 = vst [vmem:[#allocation6 + $0x8] sm:$0xff] %v1736_v25  ;;  %v943_v26 = vmul.f32 %v1093_v22, %v1736_v25 }
 0x618   :  { %946 = vadd.xlane.f32.xlu1 %v943_v26 }
 0x619   :  { %1455 = shalt.err (!%p1452_p12)
}
 0x61a   :  { %s1456_s13 = scalar_lea.hbm %s1818_s8, 256 }
 0x61b   :  { %p1457_p13 = scmp.ne.s32.totalorder %s1818_s8, %s1456_s13  ;;  %p1460_p0 = scmp.lt.u32.totalorder %s1456_s13, %s1818_s8 }
 0x61d   :  { %p1462_p1 = pnand %p1460_p0, %p1457_p13 }
 0x61f   :  { %1465 = shalt.err (!%p1462_p1)
}
 0x620   :  { %1025 = dma.vmem_to_hbm [thread:$0]  %s1020_s6, 256, %s1818_s8, [#allocation5], %s1541_s27, %s1541_s27, %s1542_s28  }
 0x621   :  { %s1546_s4 = smov [#allocation10]  }
 0x622   :  { %s1055_s18 = sshll.u32 %s1546_s4, 4  ;;  %s1056_s18 = int_to_ptr.vmem [resolvable:$true] %s1055_s18 }
 0x623   :  { %s1466_s19 = scalar_lea.vmem %s1056_s18, 256  ;;  %p1471_p3 = scmp.lt.s32.totalorder %s1056_s18, %s1056_s18 }
 0x624   :  { %p1467_p2 = scmp.ne.s32.totalorder %s1056_s18, %s1466_s19  ;;  %p1472_p4 = scmp.lt.s32.totalorder %s1466_s19, %s1466_s19 }
 0x626   :  { %p1473_p5 = por %p1472_p4, %p1471_p3 }
 0x628   :  { %p1474_p6 = pnand %p1473_p5, %p1467_p2 }
 0x62a   :  { %1477 = shalt.err (!%p1474_p6)
}
 0x62b   :  { %s1478_s3 = scalar_lea.hbm %s1821_s11, 256 }
 0x62c   :  { %p1479_p7 = scmp.ne.s32.totalorder %s1821_s11, %s1478_s3  ;;  %p1482_p8 = scmp.lt.u32.totalorder %s1478_s3, %s1821_s11 }
 0x62e   :  { %p1484_p9 = pnand %p1482_p8, %p1479_p7 }
 0x630   :  { %1487 = shalt.err (!%p1484_p9)
}
 0x631   :  { %1061 = dma.vmem_to_hbm [thread:$0]  %s1056_s18, 256, %s1821_s11, [#allocation11], %s1541_s27, %s1541_s27, %s1542_s28   ;;  %v920_v2 = vrot.slane %v1731_v23, 4  ;;  %v926_v5 = vrot.slane %v1736_v25, 4 }
 0x632   :  { %v949_v47 = vstv %s1817_s7  ;;  %s1547_s7 = smov [#allocation7]   ;;  %s1548_s6 = smov [#allocation9]  }
 0x633   :  { %v921_v4 = vadd.f32 %v920_v2, %v1731_v23  ;;  %v927_v8 = vadd.f32 %v926_v5, %v1736_v25  ;;  %s1031_s11 = sshll.u32 %s1547_s7, 4  ;;  %s1043_s29 = sshll.u32 %s1548_s6, 4  ;;  %s1032_s11 = int_to_ptr.vmem [resolvable:$true] %s1031_s11  ;;  %s1044_s29 = int_to_ptr.vmem [resolvable:$true] %s1043_s29 }
 0x634   :  { %s1488_s30 = scalar_lea.vmem %s1032_s11, 32  ;;  %p1493_p11 = scmp.lt.s32.totalorder %s1032_s11, %s1032_s11 }
 0x635   :  { %v922_v6 = vrot.slane %v921_v4, 2  ;;  %v928_v13 = vrot.slane %v927_v8, 2  ;;  %p1489_p10 = scmp.ne.s32.totalorder %s1032_s11, %s1488_s30  ;;  %p1494_p12 = scmp.lt.s32.totalorder %s1488_s30, %s1488_s30 }
 0x637   :  { %v923_v12 = vadd.f32 %v922_v6, %v921_v4  ;;  %v929_v19 = vadd.f32 %v928_v13, %v927_v8  ;;  %p1495_p13 = por %p1494_p12, %p1493_p11 }
 0x639   :  { %v924_v18 = vrot.slane %v923_v12, 1  ;;  %v930_v28 = vrot.slane %v929_v19, 1  ;;  %p1496_p0 = pnand %p1495_p13, %p1489_p10 }
 0x63b   :  { %v925_v36 = vadd.f32 %v924_v18, %v923_v12 }
 0x6a1   :  { %v945_v9 = vpop.xlane.xlu1 %944 }
 0x6a2   :  { %v950_v29 = vadd.f32 %v949_v47, %v945_v9  ;;  %v933_v9 = vmul.f32 0.125, %v925_v36 }
 0x6a4   :  { %v952_v30 = vrot.slane %v950_v29, 4 }
 0x6a5   :  { %v947_v31 = vpop.xlane.xlu1 %946 }
 0x6a6   :  { %v953_v32 = vmax.f32 %v950_v29, %v952_v30  ;;  %v951_v34 = vadd.f32 %v949_v47, %v947_v31  ;;  %v931_v47 = vadd.f32 %v930_v28, %v929_v19 }
 0x6a8   :  { %v954_v37 = vrot.slane %v953_v32, 2  ;;  %v958_v38 = vrot.slane %v951_v34, 4 }
 0x6aa   :  { %v955_v39 = vmax.f32 %v953_v32, %v954_v37  ;;  %v959_v40 = vmax.f32 %v951_v34, %v958_v38 }
 0x6ac   :  { %v956_v41 = vrot.slane %v955_v39, 1  ;;  %v960_v42 = vrot.slane %v959_v40, 2 }
 0x6ae   :  { %v957_v43 = vmax.f32 %v955_v39, %v956_v41  ;;  %v961_v45 = vmax.f32 %v959_v40, %v960_v42 }
 0x6b0   :  { %v964_v46 = vsub.f32 %v950_v29, %v957_v43  ;;  %v962_v48 = vrot.slane %v961_v45, 1 }
 0x6b2   :  { %v966_v49 = vmul.f32 1.442695, %v964_v46  ;;  %v963_v50 = vmax.f32 %v961_v45, %v962_v48 }
 0x6b4   :  { %1414 = vpow2.f32 %v966_v49  ;;  %v965_v51 = vsub.f32 %v951_v34, %v963_v50  ;;  %v934_v34 = vmul.f32 0.125, %v931_v47 }
 0x6b6   :  { %v968_v52 = vmul.f32 1.442695, %v965_v51 }
 0x6b8   :  { %1416 = vpow2.f32 %v968_v52 }
 0x6be   :  { %v1415_v53 = vpop.eup %1414 }
 0x6bf   :  { %v970_v54 = vrot.slane %v1415_v53, 4 }
 0x6c1   :  { %v971_v55 = vadd.f32 %v1415_v53, %v970_v54 }
 0x6c2   :  { %v1417_v56 = vpop.eup %1416 }
 0x6c3   :  { %v972_v57 = vrot.slane %v971_v55, 2  ;;  %v976_v58 = vrot.slane %v1417_v56, 4 }
 0x6c5   :  { %v973_v59 = vadd.f32 %v972_v57, %v971_v55  ;;  %v977_v60 = vadd.f32 %v1417_v56, %v976_v58 }
 0x6c7   :  { %v978_v61 = vrot.slane %v977_v60, 2  ;;  %v974_v62 = vrot.slane %v973_v59, 1 }
 0x6c9   :  { %v979_v63 = vadd.f32 %v978_v61, %v977_v60  ;;  %v975_v0 = vadd.f32 %v974_v62, %v973_v59 }
 0x6cb   :  { %v980_v1 = vrot.slane %v979_v63, 1  ;;  %1418 = vrcp.f32 %v975_v0 }
 0x6cd   :  { %v981_v3 = vadd.f32 %v980_v1, %v979_v63 }
 0x6cf   :  { %1420 = vrcp.f32 %v981_v3 }
 0x6d5   :  { %v1419_v10 = vpop.eup %1418 }
 0x6d6   :  { %v984_v11 = vmul.f32 %v1419_v10, %v1415_v53 }
 0x6d8   :  { %v986_v14 = vmul.f32 %v984_v11, %v1731_v23 }
 0x6d9   :  { %v1421_v15 = vpop.eup %1420 }
 0x6da   :  { %v985_v16 = vmul.f32 %v1421_v15, %v1417_v56  ;;  %v988_v17 = vrot.slane %v986_v14, 4 }
 0x6dc   :  { %v987_v20 = vmul.f32 %v985_v16, %v1736_v25  ;;  %v989_v27 = vadd.f32 %v988_v17, %v986_v14 }
 0x6de   :  { %v990_v21 = vrot.slane %v989_v27, 2  ;;  %v994_v22 = vrot.slane %v987_v20, 4 }
 0x6e0   :  { %v991_v7 = vadd.f32 %v990_v21, %v989_v27  ;;  %v995_v44 = vadd.f32 %v994_v22, %v987_v20 }
 0x6e2   :  { %v992_v24 = vrot.slane %v991_v7, 1  ;;  %v996_v26 = vrot.slane %v995_v44, 2 }
 0x6e4   :  { %v993_v29 = vadd.f32 %v992_v24, %v991_v7  ;;  %v997_v30 = vadd.f32 %v996_v26, %v995_v44 }
 0x6e6   :  { %v998_v31 = vrot.slane %v997_v30, 1  ;;  %v1000_v32 = vadd.f32 %v993_v29, %v933_v9 }
 0x6e8   :  { %v999_v37 = vadd.f32 %v998_v31, %v997_v30  ;;  %1004 = vst [vmem:[#allocation7] sm:$0x1] %v1000_v32  ;;  %v1006_v38 = vadd.f32 %v1000_v32, %v1731_v23 }
 0x6ea   :  { %v1001_v39 = vadd.f32 %v999_v37, %v934_v34  ;;  %v1008_v40 = vadd.f32 %v1006_v38, %v1654_v35 }
 0x6ec   :  { %1005 = vst [vmem:[#allocation7 + $0x1] sm:$0x1] %v1001_v39  ;;  %v1007_v41 = vadd.f32 %v1001_v39, %v1736_v25  ;;  %1010 = vst [vmem:[#allocation9] sm:$0xff] %v1008_v40 }
 0x6ed   :  { %1499 = shalt.err (!%p1496_p0)
}
 0x6ee   :  { %s1500_s14 = scalar_lea.hbm %s1819_s9, 32 }
 0x6ef   :  { %p1501_p1 = scmp.ne.s32.totalorder %s1819_s9, %s1500_s14  ;;  %p1504_p2 = scmp.lt.u32.totalorder %s1500_s14, %s1819_s9 }
 0x6f1   :  { %p1506_p3 = pnand %p1504_p2, %p1501_p1 }
 0x6f3   :  { %1509 = shalt.err (!%p1506_p3)
}
 0x6f4   :  { %s1549_s2 = smov 16   ;;  %s1550_s4 = smov 1   ;;  %v1009_v35 = vadd.f32 %v1007_v41, %v1652_v33 }
 0x6f5   :  { %1037 = dma.vmem_to_hbm [thread:$0]  %s1032_s11, 32, %s1819_s9, [#allocation8], %s1549_s2, %s1549_s2, %s1550_s4  }
 0x6f6   :  { %1011 = vst [vmem:[#allocation9 + $0x8] sm:$0xff] %v1009_v35  ;;  %s1510_s20 = scalar_lea.vmem %s1044_s29, 256  ;;  %p1515_p5 = scmp.lt.s32.totalorder %s1044_s29, %s1044_s29 }
 0x6f7   :  { %p1511_p4 = scmp.ne.s32.totalorder %s1044_s29, %s1510_s20  ;;  %p1516_p6 = scmp.lt.s32.totalorder %s1510_s20, %s1510_s20 }
 0x6f9   :  { %p1517_p7 = por %p1516_p6, %p1515_p5 }
 0x6fb   :  { %p1518_p8 = pnand %p1517_p7, %p1511_p4 }
 0x6fd   :  { %1521 = shalt.err (!%p1518_p8)
}
 0x6fe   :  { %s1522_s21 = scalar_lea.hbm %s1820_s10, 256 }
 0x6ff   :  { %p1523_p9 = scmp.ne.s32.totalorder %s1820_s10, %s1522_s21  ;;  %p1526_p10 = scmp.lt.u32.totalorder %s1522_s21, %s1820_s10 }
 0x701   :  { %p1528_p11 = pnand %p1526_p10, %p1523_p9 }
 0x703   :  { %1531 = shalt.err (!%p1528_p11)
}
 0x704   :  { %1049 = dma.vmem_to_hbm [thread:$0]  %s1044_s29, 256, %s1820_s10, [#allocation8], %s1541_s27, %s1541_s27, %s1542_s28  }
 0x705   :  { %1534 = dma.done.wait [#allocation5], 256  }
 0x706   :  { %1535 = vsyncadd [#allocation5], 4294967040 }
 0x707   :  { %1536 = dma.done.wait [#allocation8], 288  }
 0x708   :  { %1537 = vsyncadd [#allocation8], 4294967008 }
 0x709   :  { %1538 = dma.done.wait [#allocation11], 256  }
 0x70a   :  { %1539 = vsyncadd [#allocation11], 4294967040 }
 0x70b   :  { %1074 = vsyncpa [#allocation4], 1 }
 0x70c   :  { %1075 = vsyncpa [#allocation5], 1 }
 0x70d   :  { %1076 = vsyncpa [#allocation8], 1 }
 0x70e   :  { %1077 = vsyncpa [#allocation11], 1 }

</bundles_post_ra>
